<compile_context>
chip_gen: v7x
topology: tpu7x:2x2x1
jax: 0.10.0
libtpu: 0.0.40
codegen_flags: <defaults>
</compile_context>

<pallas_src>
import jax
import jax.numpy as jnp
from jax.experimental import pallas as pl
from jax.experimental.pallas import tpu as pltpu


def predictor_kernel(x_ref, w1_ref, b1_ref, w2_ref, b2_ref, o_ref):
    """One lane-dense batch tile: out = W2 @ relu(W1 @ x + b1) + b2."""
    x = x_ref[...]                                              # (hidden_in, tb)
    h = jnp.dot(w1_ref[...], x, preferred_element_type=jnp.float32)
    h = jnp.maximum(h + b1_ref[...], 0.0)                       # bias + ReLU in f32
    h = h.astype(w2_ref.dtype)                                  # back to MXU input dtype
    out = jnp.dot(w2_ref[...], h, preferred_element_type=jnp.float32)
    o_ref[...] = (out + b2_ref[...]).astype(o_ref.dtype)


def predictor_forward_fm(x_t, w1, b1, w2, b2, *, block_batch=2048,
                         compute_dtype=jnp.bfloat16):
    """Feature-major core: x_t (hidden, batch) -> out_t (out_dim, batch), f32.

    Weights are in PyTorch-native (out, in) layout; biases are 1-D.
    """
    hidden_in, batch = x_t.shape
    hidden_out = w1.shape[0]
    out_dim = w2.shape[0]

    x_c = x_t.astype(compute_dtype)
    w1_c = w1.astype(compute_dtype)
    w2_c = w2.astype(compute_dtype)
    b1_c = b1.reshape(hidden_out, 1).astype(jnp.float32)
    b2_c = b2.reshape(out_dim, 1).astype(jnp.float32)

    if batch <= block_batch:
        tb = batch                                 # single block, no grid overhead
    else:
        tb = max(128, (block_batch // 128) * 128)  # 128-aligned lane tiles
    grid = (pl.cdiv(batch, tb),)

    itm = jnp.dtype(compute_dtype).itemsize
    cost = pl.CostEstimate(
        flops=2 * batch * hidden_in * hidden_out + 2 * batch * hidden_out * out_dim,
        transcendentals=0,
        bytes_accessed=(itm * (batch * hidden_in            # x
                               + hidden_in * hidden_out     # W1 (once)
                               + hidden_out * out_dim)      # W2 (once)
                        + 4 * (hidden_out + out_dim         # biases
                               + batch * out_dim)),         # out
    )

    out_t = pl.pallas_call(
        predictor_kernel,
        out_shape=jax.ShapeDtypeStruct((out_dim, batch), jnp.float32),
        grid=grid,
        in_specs=[
            # x: tiled along the lane (batch) axis, auto-pipelined.
            pl.BlockSpec((hidden_in, tb), lambda i: (0, i)),
            # Weights / biases: constant index_map -> DMA'd once, VMEM-resident.
            pl.BlockSpec((hidden_out, hidden_in), lambda i: (0, 0)),
            pl.BlockSpec((hidden_out, 1), lambda i: (0, 0)),
            pl.BlockSpec((out_dim, hidden_out), lambda i: (0, 0)),
            pl.BlockSpec((out_dim, 1), lambda i: (0, 0)),
        ],
        out_specs=pl.BlockSpec((out_dim, tb), lambda i: (0, i)),
        compiler_params=pltpu.CompilerParams(
            dimension_semantics=("parallel",)),
        cost_estimate=cost,
    )(x_c, w1_c, b1_c, w2_c, b2_c)
    return out_t


def predictor_forward(x, w1, b1, w2, b2, *, block_batch=2048,
                      compute_dtype=jnp.bfloat16):
    """Module-layout forward: x (batch, hidden) -> (batch, input_shape).

    The transposes here are cheap layout plumbing so the kernel sees a
    lane-dense (feature-major) slab; callers that already hold feature-major
    activations should call predictor_forward_fm directly.
    """
    out_t = predictor_forward_fm(x.T, w1, b1, w2, b2,
                                 block_batch=block_batch,
                                 compute_dtype=compute_dtype)
    return out_t.T


def init_predictor_params(key, input_shape, hidden):
    """PyTorch-Linear-like uniform init; weights kept in native (out, in) layout."""
    k1, k2, k3, k4 = jax.random.split(key, 4)
    bound = 1.0 / jnp.sqrt(hidden)
    w1 = jax.random.uniform(k1, (hidden, hidden), jnp.float32, -bound, bound)
    b1 = jax.random.uniform(k2, (hidden,), jnp.float32, -bound, bound)
    w2 = jax.random.uniform(k3, (input_shape, hidden), jnp.float32, -bound, bound)
    b2 = jax.random.uniform(k4, (input_shape,), jnp.float32, -bound, bound)
    return w1, b1, w2, b2


def predictor_ref(x, w1, b1, w2, b2):
    """Exact-f32 module reference (HIGHEST-precision matmuls)."""
    hi = jax.lax.Precision.HIGHEST
    h = jnp.maximum(jnp.dot(x, w1.T, precision=hi) + b1[None, :], 0.0)
    return jnp.dot(h, w2.T, precision=hi) + b2[None, :]


def predictor_ref_matched(x, w1, b1, w2, b2, compute_dtype=jnp.bfloat16):
    """Reference reproducing the kernel's low-precision-input / f32-accumulate rounding."""
    f32 = jnp.float32
    hi = jax.lax.Precision.HIGHEST
    xc = x.astype(compute_dtype).astype(f32)
    w1c = w1.astype(compute_dtype).astype(f32)
    w2c = w2.astype(compute_dtype).astype(f32)
    h = jnp.maximum(jnp.dot(xc, w1c.T, precision=hi) + b1[None, :], 0.0)
    h = h.astype(compute_dtype).astype(f32)
    return jnp.dot(h, w2c.T, precision=hi) + b2[None, :]


if __name__ == "__main__":
    # Many predictor evaluations stacked along the batch axis (e.g. 32 rollout
    # steps x 8 envs) so the lane-dense batch axis actually has width.
    batch = 256
    hidden = 32        # perceptor hidden width
    input_shape = 16   # module's `input_shape` (final output dimension)

    key = jax.random.PRNGKey(0)
    kx, kp = jax.random.split(key)
    x = jax.random.normal(kx, (batch, hidden), jnp.float32)
    w1, b1, w2, b2 = init_predictor_params(kp, input_shape, hidden)

    ref_exact = predictor_ref(x, w1, b1, w2, b2)
    ref_match = predictor_ref_matched(x, w1, b1, w2, b2)

    # Main path: whole batch as one lane-dense block (no grid-step overhead, no pad).
    out = jax.block_until_ready(predictor_forward(x, w1, b1, w2, b2))
    assert out.shape == (batch, input_shape)
    assert jnp.allclose(out, ref_match, atol=1e-4, rtol=1e-4), "mismatch vs matched ref"
    assert jnp.allclose(out, ref_exact, atol=5e-2, rtol=5e-2), "mismatch vs f32 module ref"

    # Multi-tile grid path with a ragged final tile (no jnp.pad anywhere).
    out_r = jax.block_until_ready(
        predictor_forward(x[:200], w1, b1, w2, b2, block_batch=128))
    assert out_r.shape == (200, input_shape)
    assert jnp.allclose(out_r, ref_match[:200], atol=1e-4, rtol=1e-4), "ragged-grid mismatch"

    # Tiny batch (single sub-128-lane block).
    out_s = jax.block_until_ready(predictor_forward(x[:8], w1, b1, w2, b2))
    assert jnp.allclose(out_s, ref_match[:8], atol=1e-4, rtol=1e-4), "small-batch mismatch"

    print("KERNEL_OK")
</pallas_src>

<mosaic_0001>
module attributes {stable_mosaic.version = 11 : i64} {
  func.func @predictor_kernel(%arg0: i32, %arg1: memref<32x256xbf16, #tpu.memory_space<vmem>>, %arg2: memref<32x32xbf16, #tpu.memory_space<vmem>>, %arg3: memref<32x1xf32, #tpu.memory_space<vmem>>, %arg4: memref<16x32xbf16, #tpu.memory_space<vmem>>, %arg5: memref<16x1xf32, #tpu.memory_space<vmem>>, %arg6: memref<16x256xf32, #tpu.memory_space<vmem>>) attributes {dimension_semantics = [#tpu.dimension_semantics<parallel>], iteration_bounds = array<i64: 1>, scalar_prefetch = 0 : i64, scratch_operands = 0 : i64, tpu.core_type = #tpu.core_type<tc>, window_params = [{transform_indices = @transform_0, window_bounds = array<i64: 32, 256>}, {pipeline_mode = #tpu.pipeline_mode<synchronous>, transform_indices = @transform_1, window_bounds = array<i64: 32, 32>}, {pipeline_mode = #tpu.pipeline_mode<synchronous>, transform_indices = @transform_2, window_bounds = array<i64: 32, 1>}, {pipeline_mode = #tpu.pipeline_mode<synchronous>, transform_indices = @transform_3, window_bounds = array<i64: 16, 32>}, {pipeline_mode = #tpu.pipeline_mode<synchronous>, transform_indices = @transform_4, window_bounds = array<i64: 16, 1>}, {transform_indices = @transform_5, window_bounds = array<i64: 16, 256>}]} {
    %c0 = arith.constant 0 : index
    %c0_0 = arith.constant 0 : index
    %0 = vector.load %arg1[%c0, %c0_0] : memref<32x256xbf16, #tpu.memory_space<vmem>>, vector<32x256xbf16>
    %c0_1 = arith.constant 0 : index
    %c0_2 = arith.constant 0 : index
    %1 = vector.load %arg2[%c0_1, %c0_2] : memref<32x32xbf16, #tpu.memory_space<vmem>>, vector<32x32xbf16>
    %cst = arith.constant dense<0.000000e+00> : vector<32x256xf32>
    %2 = tpu.matmul %1, %0, %cst {dimension_numbers = #tpu.dot_dimension_numbers<[1], [0], [0], [1], [0, 0, 1, 1], [], []>} : vector<32x32xbf16>, vector<32x256xbf16>, vector<32x256xf32> -> vector<32x256xf32>
    %c0_3 = arith.constant 0 : index
    %c0_4 = arith.constant 0 : index
    %3 = vector.load %arg3[%c0_3, %c0_4] : memref<32x1xf32, #tpu.memory_space<vmem>>, vector<32x1xf32>
    %4 = vector.broadcast %3 : vector<32x1xf32> to vector<32x256xf32>
    %5 = arith.addf %2, %4 : vector<32x256xf32>
    %cst_5 = arith.constant 0.000000e+00 : f32
    %6 = vector.broadcast %cst_5 : f32 to vector<32x256xf32>
    %7 = arith.maximumf %5, %6 : vector<32x256xf32>
    %8 = arith.truncf %7 : vector<32x256xf32> to vector<32x256xbf16>
    %c0_6 = arith.constant 0 : index
    %c0_7 = arith.constant 0 : index
    %9 = vector.load %arg4[%c0_6, %c0_7] : memref<16x32xbf16, #tpu.memory_space<vmem>>, vector<16x32xbf16>
    %cst_8 = arith.constant dense<0.000000e+00> : vector<16x256xf32>
    %10 = tpu.matmul %9, %8, %cst_8 {dimension_numbers = #tpu.dot_dimension_numbers<[1], [0], [0], [1], [0, 0, 1, 1], [], []>} : vector<16x32xbf16>, vector<32x256xbf16>, vector<16x256xf32> -> vector<16x256xf32>
    %c0_9 = arith.constant 0 : index
    %c0_10 = arith.constant 0 : index
    %11 = vector.load %arg5[%c0_9, %c0_10] : memref<16x1xf32, #tpu.memory_space<vmem>>, vector<16x1xf32>
    %12 = vector.broadcast %11 : vector<16x1xf32> to vector<16x256xf32>
    %13 = arith.addf %10, %12 : vector<16x256xf32>
    %c0_11 = arith.constant 0 : index
    %c0_12 = arith.constant 0 : index
    %14 = vector.load %arg6[%c0_11, %c0_12] : memref<16x256xf32, #tpu.memory_space<vmem>>, vector<16x256xf32>
    tpu.vector_store %arg6[%c0_11, %c0_12], %13 {strides = array<i32>} : memref<16x256xf32, #tpu.memory_space<vmem>>, vector<16x256xf32>,
    return
  }
  func.func @transform_0(%arg0: i32) -> (i32, i32) {
    %c0_i32 = arith.constant 0 : i32
    %c0_i32_0 = arith.constant 0 : i32
    return %c0_i32, %arg0 : i32, i32
  }
  func.func @transform_1(%arg0: i32) -> (i32, i32) {
    %c0_i32 = arith.constant 0 : i32
    %c0_i32_0 = arith.constant 0 : i32
    %c0_i32_1 = arith.constant 0 : i32
    return %c0_i32, %c0_i32_0 : i32, i32
  }
  func.func @transform_2(%arg0: i32) -> (i32, i32) {
    %c0_i32 = arith.constant 0 : i32
    %c0_i32_0 = arith.constant 0 : i32
    %c0_i32_1 = arith.constant 0 : i32
    return %c0_i32, %c0_i32_0 : i32, i32
  }
  func.func @transform_3(%arg0: i32) -> (i32, i32) {
    %c0_i32 = arith.constant 0 : i32
    %c0_i32_0 = arith.constant 0 : i32
    %c0_i32_1 = arith.constant 0 : i32
    return %c0_i32, %c0_i32_0 : i32, i32
  }
  func.func @transform_4(%arg0: i32) -> (i32, i32) {
    %c0_i32 = arith.constant 0 : i32
    %c0_i32_0 = arith.constant 0 : i32
    %c0_i32_1 = arith.constant 0 : i32
    return %c0_i32, %c0_i32_0 : i32, i32
  }
  func.func @transform_5(%arg0: i32) -> (i32, i32) {
    %c0_i32 = arith.constant 0 : i32
    %c0_i32_0 = arith.constant 0 : i32
    return %c0_i32, %arg0 : i32, i32
  }
}

</mosaic_0001>

<bundles_post_ra>
// kernel: tpu_custom_call.1
= control target key start
LH: loop header
LB: loop body
LE: loop exit
PB: predicated region body
PF: predicated region fallthrough
CT: control target
= control target key end

     0   :  { %v290_v2 = vmov 0   ;;  %vm84_vm0 = vcmask 261120   ;;  %s378_s0 = inlined_call_operand.vmem [shape: bf16[32,256], index: 0, kind: input, shape index: {}]   ;;  %s379_s1 = inlined_call_operand.vmem [shape: bf16[32,32], index: 1, kind: input, shape index: {}]   ;;  %s380_s2 = inlined_call_operand.vmem [shape: f32[32,1], index: 2, kind: input, shape index: {}]   ;;  %s381_s3 = inlined_call_operand.vmem [shape: bf16[16,32], index: 3, kind: input, shape index: {}]   ;;  %s382_s4 = inlined_call_operand.vmem [shape: f32[16,1], index: 4, kind: input, shape index: {}]   ;;  %s383_s5 = inlined_call_operand.hbm [shape: f32[16,256], index: 5, kind: output, shape index: {}]  }
   0x1   :  { %v257_v0 = vld [vmem:[%s378_s0 + $0x4] ss:$8 sps:$4 sm:$0xff]   ;;  %v259_v1 = vld [vmem:[%s378_s0] ss:$8 sps:$4 sm:$0xff]   ;;  %123 = vmatprep.mubr.bf16.mxu0 %v290_v2  ;;  %255 = vset.pattern.permute.xlu0 %v290_v2  ;;  %v260_v3 = vld [vmem:[%s378_s0 + $0x14] ss:$8 sps:$4 sm:$0xff]  }
   0x2   :  { %91 = vmatprep.subr.bf16.mxu0 %v257_v0  ;;  %256 = vset.pattern.permute.xlu1 %v290_v2  ;;  %v262_v4 = vld [vmem:[%s378_s0 + $0x10] ss:$8 sps:$4 sm:$0xff]   ;;  %v30_v5 = vld [vmem:[%s380_s2] sm:$0xff]  ;;  %v31_v8 = vld [vmem:[%s380_s2 + $0x8] sm:$0xff] }
   0x3   :  { %92 = vmatpush1.bf16.msra.mxu0 %v259_v1  ;;  %210 = vmatprep.mubr.bf16.mxu1 %v290_v2  ;;  %v32_v6 = vld [vmem:[%s380_s2 + $0x10] sm:$0xff]  ;;  %v263_v7 = vld [vmem:[%s379_s1] sm:$0xff]   ;;  %v33_v9 = vld [vmem:[%s380_s2 + $0x18] sm:$0xff] }
   0x4   :  { %93 = vmatprep.subr.bf16.mxu0 %v260_v3  ;;  %36 = vperm.xlu0 %255, %v30_v5  }
   0x5   :  { %46 = vperm.xlu1 %256, %v32_v6  }
   0x7   :  { %94 = vmatpush1.bf16.msra.mxu0 %v262_v4 }
   0x8   :  { %10 = vsyncpa [#allocation3], 0  ;;  %41 = vperm.xlu0 %255, %v31_v8   ;;  %v158_v10 = vld [vmem:[%s382_s4] sm:$0xff]  ;;  %v159_v11 = vld [vmem:[%s382_s4 + $0x8] sm:$0xff]  ;;  %s291_s4 = smov [#allocation2]  }
   0x9   :  { %51 = vperm.xlu1 %256, %v33_v9   ;;  %v264_v12 = vld [vmem:[%s379_s1 + $0x8] sm:$0xff]   ;;  %v265_v45 = vld [vmem:[%s381_s3] sm:$0xff]   ;;  %s230_s16 = sshll.u32 %s291_s4, 4  ;;  %s231_s16 = int_to_ptr.vmem [resolvable:$true] %s230_s16 }
   0xa   :  { %247 = vmatmul.mubr.msk.bf16.vlgmr.msra.gmra.mrb[0].mxu0 %vm84_vm0, %v263_v7  ;;  %s266_s3 = scalar_lea.vmem %s231_s16, 512  ;;  %p271_p1 = scmp.lt.s32.totalorder %s231_s16, %s231_s16 }
   0xb   :  { %133 = vmatprep.mubr.bf16.mxu0 %v290_v2  ;;  %p267_p0 = scmp.ne.s32.totalorder %s231_s16, %s266_s3  ;;  %p272_p2 = scmp.lt.s32.totalorder %s266_s3, %s266_s3 }
   0xc   :  { %162 = vperm.xlu0 %255, %v158_v10  }
   0xd   :  { %167 = vperm.xlu1 %256, %v159_v11   ;;  %p273_p3 = por %p272_p2, %p271_p1 }
   0xf   :  { %p274_p4 = pnand %p273_p3, %p267_p0 }
  0x12   :  { %248 = vmatmul.mubr.msk.bf16.gmra.mrb[4].mxu0 %vm84_vm0, %v264_v12 }
  0x83   :  { %v37_v13 = vpop.permute.xlu0 %36 }
  0x84   :  { %v47_v22 = vpop.permute.xlu1 %46 }
  0x87   :  { %v42_v17 = vpop.permute.xlu0 %41 }
  0x88   :  { %v52_v33 = vpop.permute.xlu1 %51 }
  0x8b   :  { %v163_v46 = vpop.permute.xlu0 %162 }
  0x8c   :  { %v168_v50 = vpop.permute.xlu1 %167 }
  0xdd   :  { %v125_v14 = vpop.f32.mrb[0].mxu0 }
  0xde   :  { %v126_v15 = vadd.f32 %v125_v14, %v37_v13  ;;  %v127_v16 = vpop.f32.mrb[1].mxu0 }
  0xdf   :  { %v128_v18 = vadd.f32 %v127_v16, %v37_v13  ;;  %v129_v19 = vpop.f32.mrb[2].mxu0 }
  0xe0   :  { %v130_v20 = vadd.f32 %v129_v19, %v42_v17  ;;  %v131_v21 = vpop.f32.mrb[3].mxu0  ;;  %v144_v24 = vmax.f32 %v126_v15, 0.0 }
  0xe1   :  { %v132_v23 = vadd.f32 %v131_v21, %v42_v17  ;;  %v145_v26 = vmax.f32 %v128_v18, 0.0 }
  0xe2   :  { %v146_v25 = vmax.f32 %v130_v20, 0.0 }
  0xe3   :  { %v147_v27 = vmax.f32 %v132_v23, 0.0 }
  0xe4   :  { %v152_v28 = vpack.c.bf16 %v146_v25, %v144_v24 }
  0xe5   :  { %v135_v29 = vpop.f32.mrb[4].mxu0  ;;  %v153_v30 = vpack.c.bf16 %v147_v27, %v145_v26 }
  0xe6   :  { %v136_v31 = vadd.f32 %v135_v29, %v47_v22  ;;  %v137_v32 = vpop.f32.mrb[5].mxu0 }
  0xe7   :  { %v138_v34 = vadd.f32 %v137_v32, %v47_v22  ;;  %v139_v35 = vpop.f32.mrb[6].mxu0  ;;  %178 = vmatprep.subr.bf16.mxu1 %v153_v30 }
  0xe8   :  { %v140_v36 = vadd.f32 %v139_v35, %v52_v33  ;;  %v141_v37 = vpop.f32.mrb[7].mxu0  ;;  %179 = vmatpush1.bf16.msra.mxu1 %v152_v28  ;;  %v148_v39 = vmax.f32 %v136_v31, 0.0 }
  0xe9   :  { %v142_v38 = vadd.f32 %v141_v37, %v52_v33  ;;  %v149_v41 = vmax.f32 %v138_v34, 0.0 }
  0xea   :  { %v150_v40 = vmax.f32 %v140_v36, 0.0 }
  0xeb   :  { %v151_v42 = vmax.f32 %v142_v38, 0.0 }
  0xec   :  { %v154_v43 = vpack.c.bf16 %v150_v40, %v148_v39 }
  0xed   :  { %v155_v44 = vpack.c.bf16 %v151_v42, %v149_v41 }
  0xef   :  { %180 = vmatprep.subr.bf16.mxu1 %v155_v44 }
  0xf0   :  { %181 = vmatpush1.bf16.msra.mxu1 %v154_v43 }
  0xf3   :  { %250 = vmatmul.mubr.msk.bf16.vlgmr.msra.gmra.mrb[0].mxu1 %vm84_vm0, %v265_v45 }
 0x1c6   :  { %v212_v47 = vpop.f32.mrb[0].mxu1 }
 0x1c7   :  { %v213_v48 = vadd.f32 %v212_v47, %v163_v46  ;;  %v214_v49 = vpop.f32.mrb[1].mxu1 }
 0x1c8   :  { %v215_v51 = vadd.f32 %v214_v49, %v163_v46  ;;  %v216_v52 = vpop.f32.mrb[2].mxu1 }
 0x1c9   :  { %221 = vst [vmem:[#allocation2] sm:$0xff] %v213_v48  ;;  %v217_v53 = vadd.f32 %v216_v52, %v168_v50  ;;  %v218_v54 = vpop.f32.mrb[3].mxu1 }
 0x1ca   :  { %222 = vst [vmem:[#allocation2 + $0x8] sm:$0xff] %v215_v51  ;;  %v219_v55 = vadd.f32 %v218_v54, %v168_v50 }
 0x1cb   :  { %223 = vst [vmem:[#allocation2 + $0x10] sm:$0xff] %v217_v53 }
 0x1cc   :  { %224 = vst [vmem:[#allocation2 + $0x18] sm:$0xff] %v219_v55 }
 0x1cd   :  { %277 = shalt.err (!%p274_p4)
}
 0x1ce   :  { %s278_s19 = scalar_lea.hbm %s383_s5, 512 }
 0x1cf   :  { %p279_p5 = scmp.ne.s32.totalorder %s383_s5, %s278_s19  ;;  %p282_p6 = scmp.lt.u32.totalorder %s278_s19, %s383_s5 }
 0x1d1   :  { %p284_p7 = pnand %p282_p6, %p279_p5 }
 0x1d3   :  { %287 = shalt.err (!%p284_p7)
}
 0x1d4   :  { %s292_s24 = smov 256   ;;  %s293_s25 = smov 16  }
 0x1d5   :  { %236 = dma.vmem_to_hbm [thread:$0]  %s231_s16, 512, %s383_s5, [#allocation3], %s292_s24, %s292_s24, %s293_s25  }
 0x1d6   :  { %288 = dma.done.wait [#allocation3], 512  }
 0x1d7   :  { %289 = vsyncadd [#allocation3], 4294966784 }
 0x1d8   :  { %240 = vsyncpa [#allocation3], 1 }

</bundles_post_ra>
